<compile_context>
chip_gen: v7x
topology: tpu7x:2x2x1
jax: 0.10.0
libtpu: 0.0.40
codegen_flags: <defaults>
</compile_context>

<pallas_src>
import math

import jax
import jax.numpy as jnp
from jax.experimental import pallas as pl
from jax.experimental.pallas import tpu as pltpu

_SQRT_2_OVER_PI = math.sqrt(2.0 / math.pi)
_HORNER_B = 0.044715 * _SQRT_2_OVER_PI
_LANE_CANDIDATES = (8192, 4096, 2048, 1024, 512, 256, 128)


def _chip_config():
    """Returns (block_bytes, vmem_limit_bytes, tensorcores_per_chip, bf16_vpu)."""
    try:
        kind = jax.devices()[0].device_kind.lower()
    except Exception:  # pragma: no cover - defensive
        kind = ""
    if "v7" in kind:
        # 64 MiB VMEM per TC, 3.2 TB/s HBM, 2 TCs/chip (megacore), bf16 VPU.
        return 8 << 20, 40 << 20, 2, True
    if "v6" in kind:
        # 128 MiB VMEM, 1.4 TB/s HBM, 1 TC, bf16 VPU.
        return 8 << 20, 48 << 20, 1, True
    if "v5" in kind or "v4" in kind:
        # v5e: 16 MiB scoped-VMEM default; modest blocks + slightly raised limit.
        return 4 << 20, 24 << 20, 1, False
    # Unknown chip: conservative defaults.
    return 4 << 20, 32 << 20, 1, False


def _make_gelu_kernel(compute_dtype):
    def kernel(x_ref, o_ref):
        x = x_ref[...].astype(compute_dtype)
        # Horner form of sqrt(2/pi) * (x + 0.044715 * x^3): one fewer vmul.
        inner = x * (_SQRT_2_OVER_PI + _HORNER_B * (x * x))
        o_ref[...] = (0.5 * x * (1.0 + jnp.tanh(inner))).astype(o_ref.dtype)

    return kernel


def _gelu_jnp(x, compute_dtype):
    """Plain-jnp tail path (fused by XLA) for the ragged remainder."""
    xf = x.astype(compute_dtype)
    inner = xf * (_SQRT_2_OVER_PI + _HORNER_B * (xf * xf))
    return (0.5 * xf * (1.0 + jnp.tanh(inner))).astype(x.dtype)


def _gelu_2d(x2d, compute_dtype, block_bytes, vmem_limit, num_tc):
    """Run the Pallas kernel over a lane-dense (rows, lane) slab."""
    rows, lane = x2d.shape
    dtype = x2d.dtype
    itemsize = jnp.dtype(dtype).itemsize

    # Largest (multiple-of-8) row count whose block fits the per-step budget.
    max_rows = max(8, (((block_bytes // itemsize) // lane) // 8) * 8)

    if rows <= max_rows:
        if num_tc >= 2 and rows % (8 * num_tc) == 0 and rows >= 8 * num_tc:
            # Split into num_tc *equal* (8,128)-aligned blocks so megacore
            # shards the parallel axis evenly.
            row_tile = rows // num_tc
        else:
            # Single full-array block (no extra grid-step overhead on 1-TC
            # chips; also the only legal choice when rows is not 8-aligned).
            row_tile = rows
    else:
        steps = pl.cdiv(rows, max_rows)
        if num_tc > 1:
            # Even step count -> balanced work across TensorCores.
            steps = ((steps + num_tc - 1) // num_tc) * num_tc
        row_tile = min(max_rows, ((pl.cdiv(rows, steps) + 7) // 8) * 8)

    grid = (pl.cdiv(rows, row_tile),)  # ragged last block masked by Pallas

    n = rows * lane
    cost = pl.CostEstimate(
        flops=7 * n,
        transcendentals=n,
        bytes_accessed=2 * n * itemsize,
    )

    return pl.pallas_call(
        _make_gelu_kernel(compute_dtype),
        out_shape=jax.ShapeDtypeStruct((rows, lane), dtype),
        grid_spec=pltpu.PrefetchScalarGridSpec(
            num_scalar_prefetch=0,
            grid=grid,
            in_specs=[pl.BlockSpec((row_tile, lane), lambda i: (i, 0))],
            out_specs=pl.BlockSpec((row_tile, lane), lambda i: (i, 0)),
        ),
        compiler_params=pltpu.CompilerParams(
            dimension_semantics=("parallel",),
            vmem_limit_bytes=vmem_limit,
        ),
        cost_estimate=cost,
    )(x2d)


def gelu(x: jax.Array) -> jax.Array:
    """Tanh-approximation GELU, computed in a Pallas TPU kernel."""
    orig_shape = x.shape
    dtype = x.dtype
    n = x.size
    if n == 0:
        return x

    block_bytes, vmem_limit, num_tc, has_bf16_vpu = _chip_config()

    # Keep bf16 streams in bf16 where the VPU supports it (v6e/v7x); f32 math
    # elsewhere (v5e has no bf16 VPU/EUP; f32 inputs stay f32).
    compute_dtype = jnp.float32
    if dtype == jnp.bfloat16 and has_bf16_vpu:
        compute_dtype = jnp.bfloat16

    # Widest lane that divides the flattened length -> lane-dense output.
    lane = None
    for cand in _LANE_CANDIDATES:
        if n % cand == 0:
            lane = cand
            break

    x_flat = jnp.reshape(x, (-1,))

    if lane is not None:
        rows = n // lane
        out2d = _gelu_2d(jnp.reshape(x_flat, (rows, lane)), compute_dtype,
                         block_bytes, vmem_limit, num_tc)
        return jnp.reshape(out2d, orig_shape)

    # Ragged fallback (n % 128 != 0): kernel on the 128-aligned prefix, plain
    # jnp on the <128-element tail. No full-tensor pad/slice round trip.
    lane = 128
    n_main = (n // lane) * lane
    tail_out = _gelu_jnp(x_flat[n_main:], compute_dtype)
    if n_main == 0:
        out_flat = tail_out
    else:
        rows = n_main // lane
        main_out = _gelu_2d(jnp.reshape(x_flat[:n_main], (rows, lane)),
                            compute_dtype, block_bytes, vmem_limit, num_tc)
        out_flat = jnp.concatenate([jnp.reshape(main_out, (-1,)), tail_out])
    return jnp.reshape(out_flat, orig_shape)


def _gelu_ref(x):
    xf = x.astype(jnp.float32)
    return (0.5 * xf * (1.0 + jnp.tanh(_SQRT_2_OVER_PI *
                                       (xf + 0.044715 * xf ** 3)))).astype(x.dtype)


if __name__ == "__main__":
    key = jax.random.PRNGKey(0)

    # Primary test: small NCHW feature map (2, 4, 16, 16).
    x = jax.random.normal(key, (2, 4, 16, 16), dtype=jnp.float32)
    y = gelu(x)
    jax.block_until_ready(y)
    y_ref = _gelu_ref(x)
    assert y.shape == x.shape and y.dtype == x.dtype
    assert jnp.allclose(y, y_ref, atol=1e-5, rtol=1e-5)

    # Exercise the multi-row / wide-lane path.
    k1, k2, k3 = jax.random.split(key, 3)
    x2 = jax.random.normal(k1, (4, 8, 32, 32), dtype=jnp.float32)
    y2 = gelu(x2)
    jax.block_until_ready(y2)
    assert jnp.allclose(y2, _gelu_ref(x2), atol=1e-5, rtol=1e-5)

    # Exercise the n % 128 != 0 ragged fallback (prefix kernel + jnp tail).
    x3 = jax.random.normal(k2, (3, 5, 7, 11), dtype=jnp.float32)
    y3 = gelu(x3)
    jax.block_until_ready(y3)
    assert jnp.allclose(y3, _gelu_ref(x3), atol=1e-5, rtol=1e-5)

    # Exercise the bf16 path (bf16 compute on v6e/v7x, f32 upcast elsewhere).
    x4 = jax.random.normal(k3, (2, 4, 16, 16), dtype=jnp.bfloat16)
    y4 = gelu(x4)
    jax.block_until_ready(y4)
    assert y4.dtype == jnp.bfloat16
    assert jnp.allclose(y4.astype(jnp.float32),
                        _gelu_ref(x4).astype(jnp.float32),
                        atol=6e-2, rtol=6e-2)

    print("KERNEL_OK")
</pallas_src>

<mosaic_0001>
module attributes {stable_mosaic.version = 11 : i64} {
  func.func @kernel(%arg0: i32, %arg1: memref<1x2048xf32, #tpu.memory_space<vmem>>, %arg2: memref<1x2048xf32, #tpu.memory_space<vmem>>) attributes {dimension_semantics = [#tpu.dimension_semantics<parallel>], iteration_bounds = array<i64: 1>, scalar_prefetch = 0 : i64, scratch_operands = 0 : i64, tpu.core_type = #tpu.core_type<tc>, window_params = [{transform_indices = @transform_0, window_bounds = array<i64: 1, 2048>}, {transform_indices = @transform_1, window_bounds = array<i64: 1, 2048>}]} {
    %c0 = arith.constant 0 : index
    %c0_0 = arith.constant 0 : index
    %0 = vector.load %arg1[%c0, %c0_0] : memref<1x2048xf32, #tpu.memory_space<vmem>>, vector<1x2048xf32>
    %1 = arith.mulf %0, %0 : vector<1x2048xf32>
    %cst = arith.constant 0.0356774069 : f32
    %2 = vector.broadcast %cst : f32 to vector<1x2048xf32>
    %3 = arith.mulf %2, %1 : vector<1x2048xf32>
    %cst_1 = arith.constant 0.797884583 : f32
    %4 = vector.broadcast %cst_1 : f32 to vector<1x2048xf32>
    %5 = arith.addf %4, %3 : vector<1x2048xf32>
    %6 = arith.mulf %0, %5 : vector<1x2048xf32>
    %cst_2 = arith.constant 5.000000e-01 : f32
    %7 = vector.broadcast %cst_2 : f32 to vector<1x2048xf32>
    %8 = arith.mulf %7, %0 : vector<1x2048xf32>
    %9 = math.tanh %6 : vector<1x2048xf32>
    %cst_3 = arith.constant 1.000000e+00 : f32
    %10 = vector.broadcast %cst_3 : f32 to vector<1x2048xf32>
    %11 = arith.addf %10, %9 : vector<1x2048xf32>
    %12 = arith.mulf %8, %11 : vector<1x2048xf32>
    %c0_4 = arith.constant 0 : index
    %c0_5 = arith.constant 0 : index
    %13 = vector.load %arg2[%c0_4, %c0_5] : memref<1x2048xf32, #tpu.memory_space<vmem>>, vector<1x2048xf32>
    tpu.vector_store %arg2[%c0_4, %c0_5], %12 {strides = array<i32>} : memref<1x2048xf32, #tpu.memory_space<vmem>>, vector<1x2048xf32>,
    return
  }
  func.func @transform_0(%arg0: i32) -> (i32, i32) {
    %c0_i32 = arith.constant 0 : i32
    %c0_i32_0 = arith.constant 0 : i32
    return %arg0, %c0_i32 : i32, i32
  }
  func.func @transform_1(%arg0: i32) -> (i32, i32) {
    %c0_i32 = arith.constant 0 : i32
    %c0_i32_0 = arith.constant 0 : i32
    return %arg0, %c0_i32 : i32, i32
  }
}

</mosaic_0001>

<bundles_post_ra>
// kernel: tpu_custom_call.1
= control target key start
LH: loop header
LB: loop body
LE: loop exit
PB: predicated region body
PF: predicated region fallthrough
CT: control target
= control target key end

     0   :  { %6 = vsyncpa [#allocation3], 0  ;;  %s146_s0 = inlined_call_operand.hbm [shape: f32[1,2048], index: 0, kind: input, shape index: {}]   ;;  %s147_s1 = inlined_call_operand.hbm [shape: f32[1,2048], index: 1, kind: output, shape index: {}]  }
   0x1   :  { %7 = vsyncpa [#allocation4], 0  ;;  %s110_s6 = smov [#allocation2]   ;;  %s62_s10 = scalar_lea.hbm %s146_s0, 256 }
   0x2   :  { %s14_s7 = sshll.u32 %s110_s6, 4  ;;  %p63_p0 = scmp.ne.s32.totalorder %s146_s0, %s62_s10  ;;  %s15_s7 = int_to_ptr.vmem [resolvable:$true] %s14_s7 }
   0x3   :  { %p66_p1 = scmp.lt.u32.totalorder %s62_s10, %s146_s0 }
   0x5   :  { %p68_p2 = pnand %p66_p1, %p63_p0 }
   0x7   :  { %71 = shalt.err (!%p68_p2)
}
   0x8   :  { %s72_s15 = scalar_lea.vmem %s15_s7, 256  ;;  %p77_p4 = scmp.lt.s32.totalorder %s15_s7, %s15_s7 }
   0x9   :  { %p73_p3 = scmp.ne.s32.totalorder %s15_s7, %s72_s15  ;;  %p78_p5 = scmp.lt.s32.totalorder %s72_s15, %s72_s15 }
   0xb   :  { %p79_p6 = por %p78_p5, %p77_p4 }
   0xd   :  { %p80_p7 = pnand %p79_p6, %p73_p3 }
   0xf   :  { %83 = shalt.err (!%p80_p7)
}
  0x10   :  { %17 = dma.hbm_to_vmem [thread:$0]  %s146_s0, 256, %s15_s7, [#allocation3]  }
  0x11   :  { %106 = dma.done.wait [#allocation3], 256  }
  0x12   :  { %107 = vsyncadd [#allocation3], 4294967040  ;;  %v21_v0 = vld [vmem:[#allocation2] sm:$0xff]  ;;  %v22_v1 = vld [vmem:[#allocation2 + $0x8] sm:$0xff]  ;;  %s111_s0 = smov [#allocation5]  }
  0x13   :  { %v23_v2 = vmul.f32 %v21_v0, %v21_v0  ;;  %v24_v3 = vmul.f32 %v22_v1, %v22_v1  ;;  %v31_v10 = vmul.f32 0.5, %v21_v0  ;;  %v32_v12 = vmul.f32 0.5, %v22_v1  ;;  %s47_s18 = sshll.u32 %s111_s0, 4  ;;  %s48_s18 = int_to_ptr.vmem [resolvable:$true] %s47_s18 }
  0x14   :  { %s84_s19 = scalar_lea.vmem %s48_s18, 256  ;;  %p89_p9 = scmp.lt.s32.totalorder %s48_s18, %s48_s18 }
  0x15   :  { %v25_v4 = vmul.f32 0.035677407, %v23_v2  ;;  %v26_v5 = vmul.f32 0.035677407, %v24_v3  ;;  %p85_p8 = scmp.ne.s32.totalorder %s48_s18, %s84_s19  ;;  %p90_p10 = scmp.lt.s32.totalorder %s84_s19, %s84_s19 }
  0x17   :  { %v27_v6 = vadd.f32 0.7978846, %v25_v4  ;;  %v28_v7 = vadd.f32 0.7978846, %v26_v5  ;;  %p91_p11 = por %p90_p10, %p89_p9 }
  0x19   :  { %v29_v8 = vmul.f32 %v27_v6, %v21_v0  ;;  %v30_v9 = vmul.f32 %v28_v7, %v22_v1  ;;  %p92_p12 = pnand %p91_p11, %p85_p8 }
  0x1b   :  { %58 = vtanh.f32 %v29_v8 }
  0x1c   :  { %60 = vtanh.f32 %v30_v9 }
  0x25   :  { %v59_v11 = vpop.eup %58 }
  0x26   :  { %v61_v13 = vpop.eup %60  ;;  %v35_v14 = vadd.f32 1.0, %v59_v11 }
  0x27   :  { %v36_v15 = vadd.f32 1.0, %v61_v13 }
  0x28   :  { %v37_v16 = vmul.f32 %v35_v14, %v31_v10 }
  0x29   :  { %v38_v17 = vmul.f32 %v36_v15, %v32_v12 }
  0x2a   :  { %39 = vst [vmem:[#allocation5] sm:$0xff] %v37_v16 }
  0x2b   :  { %40 = vst [vmem:[#allocation5 + $0x8] sm:$0xff] %v38_v17 }
  0x2c   :  { %95 = shalt.err (!%p92_p12)
}
  0x2d   :  { %s96_s22 = scalar_lea.hbm %s147_s1, 256 }
  0x2e   :  { %p97_p13 = scmp.ne.s32.totalorder %s147_s1, %s96_s22  ;;  %p100_p0 = scmp.lt.u32.totalorder %s96_s22, %s147_s1 }
  0x30   :  { %p102_p1 = pnand %p100_p0, %p97_p13 }
  0x32   :  { %105 = shalt.err (!%p102_p1)
}
  0x33   :  { %50 = dma.vmem_to_hbm [thread:$0]  %s48_s18, 256, %s147_s1, [#allocation4]  }
  0x34   :  { %108 = dma.done.wait [#allocation4], 256  }
  0x35   :  { %109 = vsyncadd [#allocation4], 4294967040 }
  0x36   :  { %54 = vsyncpa [#allocation3], 1 }
  0x37   :  { %55 = vsyncpa [#allocation4], 1 }

</bundles_post_ra>
